<compile_context>
chip_gen: v7x
topology: tpu7x:2x2x1
jax: 0.10.0
libtpu: 0.0.40
codegen_flags: <defaults>
</compile_context>

<pallas_src>
import math
import jax
import jax.numpy as jnp
from jax.experimental import pallas as pl
from jax.experimental.pallas import tpu as pltpu

LANE = 128


def _round_up(x, m):
    return ((x + m - 1) // m) * m


def _hybrid_precoder_kernel(a_ref, m_ref, s_ref, x_ref):
    # a_ref: (2Nt, 2NRF)      block-real analog precoder [[Ar,-Ai],[Ai,Ar]]
    # m_ref: (2Ns, 2NRF, Kt)  block-real digital precoder, K on lanes
    # s_ref: (2Ns, 1, Kt)     stacked [s_r; s_i] symbols,  K on lanes
    # x_ref: (2Nt, Kt)        output [Xr; Xi],             K on lanes
    two_ns = m_ref.shape[0]

    # Y = VD_k @ s_k for every k in the tile, as an unrolled, tree-reduced
    # accumulation over the small leading axis: VPU multiply-adds only, K
    # stays on the lane axis (no cross-lane reduce).
    terms = [m_ref[c] * s_ref[c] for c in range(two_ns)]          # each (2NRF, Kt)
    while len(terms) > 1:
        nxt = [terms[i] + terms[i + 1] for i in range(0, len(terms) - 1, 2)]
        if len(terms) % 2 == 1:
            nxt.append(terms[-1])
        terms = nxt
    y = terms[0]                                                  # (2NRF, Kt)

    # X = VA @ Y as a single real MXU matmul with K on the N / lane axis.
    x_ref[...] = jnp.dot(a_ref[...], y, preferred_element_type=jnp.float32)


def hybrid_precoder_forward(analog_phases, digital_precoder, s_t):
    """analog_phases:    [Nt, NRF] float32 (phases of the analog precoder)
       digital_precoder: [K, NRF, Ns] complex64
       s_t:              [K, Ns, 1] complex64
       returns x_t:      [K, Nt] complex64
    """
    Nt, NRF = analog_phases.shape
    K, _, Ns = digital_precoder.shape

    # ---- parameter / layout glue (wrapper side) ----------------------------
    # Block-real analog precoder: [[Ar, -Ai], [Ai, Ar]] -> (2Nt, 2NRF)
    ar = jnp.cos(analog_phases).astype(jnp.float32)
    ai = jnp.sin(analog_phases).astype(jnp.float32)
    a_block = jnp.concatenate(
        [jnp.concatenate([ar, -ai], axis=1),
         jnp.concatenate([ai, ar], axis=1)], axis=0)              # (2Nt, 2NRF)

    # Block-real digital precoder per k: [[VDr,-VDi],[VDi,VDr]] (2NRF, 2Ns),
    # transposed so K lands on the lane (last) axis: (2Ns, 2NRF, K).
    vdr = jnp.real(digital_precoder).astype(jnp.float32)          # (K, NRF, Ns)
    vdi = jnp.imag(digital_precoder).astype(jnp.float32)
    m = jnp.concatenate(
        [jnp.concatenate([vdr, -vdi], axis=2),
         jnp.concatenate([vdi, vdr], axis=2)], axis=1)            # (K, 2NRF, 2Ns)
    m = jnp.transpose(m, (2, 1, 0))                               # (2Ns, 2NRF, K)

    # Stacked symbols [s_r; s_i] with K on lanes: (2Ns, 1, K)
    sr = jnp.real(s_t).astype(jnp.float32).reshape(K, Ns)
    si = jnp.imag(s_t).astype(jnp.float32).reshape(K, Ns)
    sv = jnp.transpose(jnp.concatenate([sr, si], axis=1), (1, 0))[:, None, :]

    # ---- lane-aligned K tiling, coarse grid ---------------------------------
    # Kt is a multiple of 128 lanes (full-width unmasked stores); the tile is
    # tiny (<< v7x's 64 MiB VMEM) even for large Nt/Ns, so no vmem_limit needed.
    Kt = min(_round_up(K, LANE), 512)
    Kp = _round_up(K, Kt)
    if Kp != K:
        m = jnp.pad(m, ((0, 0), (0, 0), (0, Kp - K)))
        sv = jnp.pad(sv, ((0, 0), (0, 0), (0, Kp - K)))
    grid = (Kp // Kt,)

    x_block = pl.pallas_call(
        _hybrid_precoder_kernel,
        out_shape=jax.ShapeDtypeStruct((2 * Nt, Kp), jnp.float32),
        grid_spec=pltpu.PrefetchScalarGridSpec(
            num_scalar_prefetch=0,
            grid=grid,
            in_specs=[
                pl.BlockSpec((2 * Nt, 2 * NRF), lambda j: (0, 0)),         # VA (resident)
                pl.BlockSpec((2 * Ns, 2 * NRF, Kt), lambda j: (0, 0, j)),  # VD block-real
                pl.BlockSpec((2 * Ns, 1, Kt), lambda j: (0, 0, j)),        # symbols
            ],
            out_specs=pl.BlockSpec((2 * Nt, Kt), lambda j: (0, j)),
        ),
        compiler_params=pltpu.CompilerParams(
            dimension_semantics=("parallel",)),
    )(a_block, m, sv)

    # Unpack: rows [0:Nt] = real, [Nt:2Nt] = imag; columns [0:K] are valid.
    x_r = x_block[:Nt, :K].T                                      # (K, Nt)
    x_i = x_block[Nt:, :K].T
    return (x_r + 1j * x_i).astype(jnp.complex64)


if __name__ == "__main__":
    # Module hyper-parameters (small, consistent with __init__ shapes)
    Nt, NRF, Ns, K = 16, 8, 4, 2

    key = jax.random.PRNGKey(0)
    k1, k2, k3, k4, k5 = jax.random.split(key, 5)

    # Deterministic "buffers" (mirror torch.rand * 2*pi init)
    analog_phases = jax.random.uniform(k1, (Nt, NRF), jnp.float32) * 2.0 * math.pi
    angles = jax.random.uniform(k2, (K, NRF, Ns), jnp.float32) * 2.0 * math.pi
    digital_precoder = jnp.exp(1j * angles.astype(jnp.complex64))   # [K, NRF, Ns]
    _beta = jax.random.uniform(k3, (K,), jnp.float32)   # buffer unused in forward

    # Input symbols s_t: [K, Ns, 1] complex64
    s_re = jax.random.normal(k4, (K, Ns, 1), jnp.float32)
    s_im = jax.random.normal(k5, (K, Ns, 1), jnp.float32)
    s_t = (s_re + 1j * s_im).astype(jnp.complex64)

    # Pallas kernel
    x_t = hybrid_precoder_forward(analog_phases, digital_precoder, s_t)
    x_t = jax.block_until_ready(x_t)

    # Pure-JAX reference of the PyTorch forward
    VA = jnp.exp(1j * analog_phases.astype(jnp.complex64))          # [Nt, NRF]
    V = jnp.matmul(VA[None, :, :], digital_precoder)                # [K, Nt, Ns]
    x_ref = jnp.squeeze(jnp.matmul(V, s_t), axis=-1)                # [K, Nt]

    assert x_t.shape == (K, Nt) and x_t.dtype == jnp.complex64
    assert jnp.allclose(x_t, x_ref, atol=1e-3, rtol=1e-3), "mismatch vs reference"
    print("KERNEL_OK")
</pallas_src>

<mosaic_0001>
module attributes {stable_mosaic.version = 11 : i64} {
  func.func @_hybrid_precoder_kernel(%arg0: i32, %arg1: memref<32x16xf32, #tpu.memory_space<vmem>>, %arg2: memref<8x16x128xf32, #tpu.memory_space<vmem>>, %arg3: memref<8x1x128xf32, #tpu.memory_space<vmem>>, %arg4: memref<32x128xf32, #tpu.memory_space<vmem>>) attributes {dimension_semantics = [#tpu.dimension_semantics<parallel>], iteration_bounds = array<i64: 1>, scalar_prefetch = 0 : i64, scratch_operands = 0 : i64, tpu.core_type = #tpu.core_type<tc>, window_params = [{pipeline_mode = #tpu.pipeline_mode<synchronous>, transform_indices = @transform_0, window_bounds = array<i64: 32, 16>}, {transform_indices = @transform_1, window_bounds = array<i64: 8, 16, 128>}, {transform_indices = @transform_2, window_bounds = array<i64: 8, 1, 128>}, {transform_indices = @transform_3, window_bounds = array<i64: 32, 128>}]} {
    %c0 = arith.constant 0 : index
    %c0_0 = arith.constant 0 : index
    %c0_1 = arith.constant 0 : index
    %0 = vector.load %arg2[%c0, %c0_0, %c0_1] : memref<8x16x128xf32, #tpu.memory_space<vmem>>, vector<1x16x128xf32>
    %1 = vector.shape_cast %0 : vector<1x16x128xf32> to vector<16x128xf32>
    %c0_2 = arith.constant 0 : index
    %c0_3 = arith.constant 0 : index
    %c0_4 = arith.constant 0 : index
    %2 = vector.load %arg3[%c0_2, %c0_3, %c0_4] : memref<8x1x128xf32, #tpu.memory_space<vmem>>, vector<1x1x128xf32>
    %3 = vector.shape_cast %2 : vector<1x1x128xf32> to vector<1x128xf32>
    %4 = vector.broadcast %3 : vector<1x128xf32> to vector<16x128xf32>
    %5 = arith.mulf %1, %4 : vector<16x128xf32>
    %c1 = arith.constant 1 : index
    %c0_5 = arith.constant 0 : index
    %c0_6 = arith.constant 0 : index
    %6 = vector.load %arg2[%c1, %c0_5, %c0_6] : memref<8x16x128xf32, #tpu.memory_space<vmem>>, vector<1x16x128xf32>
    %7 = vector.shape_cast %6 : vector<1x16x128xf32> to vector<16x128xf32>
    %c1_7 = arith.constant 1 : index
    %c0_8 = arith.constant 0 : index
    %c0_9 = arith.constant 0 : index
    %8 = vector.load %arg3[%c1_7, %c0_8, %c0_9] : memref<8x1x128xf32, #tpu.memory_space<vmem>>, vector<1x1x128xf32>
    %9 = vector.shape_cast %8 : vector<1x1x128xf32> to vector<1x128xf32>
    %10 = vector.broadcast %9 : vector<1x128xf32> to vector<16x128xf32>
    %11 = arith.mulf %7, %10 : vector<16x128xf32>
    %c2 = arith.constant 2 : index
    %c0_10 = arith.constant 0 : index
    %c0_11 = arith.constant 0 : index
    %12 = vector.load %arg2[%c2, %c0_10, %c0_11] : memref<8x16x128xf32, #tpu.memory_space<vmem>>, vector<1x16x128xf32>
    %13 = vector.shape_cast %12 : vector<1x16x128xf32> to vector<16x128xf32>
    %c2_12 = arith.constant 2 : index
    %c0_13 = arith.constant 0 : index
    %c0_14 = arith.constant 0 : index
    %14 = vector.load %arg3[%c2_12, %c0_13, %c0_14] : memref<8x1x128xf32, #tpu.memory_space<vmem>>, vector<1x1x128xf32>
    %15 = vector.shape_cast %14 : vector<1x1x128xf32> to vector<1x128xf32>
    %16 = vector.broadcast %15 : vector<1x128xf32> to vector<16x128xf32>
    %17 = arith.mulf %13, %16 : vector<16x128xf32>
    %c3 = arith.constant 3 : index
    %c0_15 = arith.constant 0 : index
    %c0_16 = arith.constant 0 : index
    %18 = vector.load %arg2[%c3, %c0_15, %c0_16] : memref<8x16x128xf32, #tpu.memory_space<vmem>>, vector<1x16x128xf32>
    %19 = vector.shape_cast %18 : vector<1x16x128xf32> to vector<16x128xf32>
    %c3_17 = arith.constant 3 : index
    %c0_18 = arith.constant 0 : index
    %c0_19 = arith.constant 0 : index
    %20 = vector.load %arg3[%c3_17, %c0_18, %c0_19] : memref<8x1x128xf32, #tpu.memory_space<vmem>>, vector<1x1x128xf32>
    %21 = vector.shape_cast %20 : vector<1x1x128xf32> to vector<1x128xf32>
    %22 = vector.broadcast %21 : vector<1x128xf32> to vector<16x128xf32>
    %23 = arith.mulf %19, %22 : vector<16x128xf32>
    %c4 = arith.constant 4 : index
    %c0_20 = arith.constant 0 : index
    %c0_21 = arith.constant 0 : index
    %24 = vector.load %arg2[%c4, %c0_20, %c0_21] : memref<8x16x128xf32, #tpu.memory_space<vmem>>, vector<1x16x128xf32>
    %25 = vector.shape_cast %24 : vector<1x16x128xf32> to vector<16x128xf32>
    %c4_22 = arith.constant 4 : index
    %c0_23 = arith.constant 0 : index
    %c0_24 = arith.constant 0 : index
    %26 = vector.load %arg3[%c4_22, %c0_23, %c0_24] : memref<8x1x128xf32, #tpu.memory_space<vmem>>, vector<1x1x128xf32>
    %27 = vector.shape_cast %26 : vector<1x1x128xf32> to vector<1x128xf32>
    %28 = vector.broadcast %27 : vector<1x128xf32> to vector<16x128xf32>
    %29 = arith.mulf %25, %28 : vector<16x128xf32>
    %c5 = arith.constant 5 : index
    %c0_25 = arith.constant 0 : index
    %c0_26 = arith.constant 0 : index
    %30 = vector.load %arg2[%c5, %c0_25, %c0_26] : memref<8x16x128xf32, #tpu.memory_space<vmem>>, vector<1x16x128xf32>
    %31 = vector.shape_cast %30 : vector<1x16x128xf32> to vector<16x128xf32>
    %c5_27 = arith.constant 5 : index
    %c0_28 = arith.constant 0 : index
    %c0_29 = arith.constant 0 : index
    %32 = vector.load %arg3[%c5_27, %c0_28, %c0_29] : memref<8x1x128xf32, #tpu.memory_space<vmem>>, vector<1x1x128xf32>
    %33 = vector.shape_cast %32 : vector<1x1x128xf32> to vector<1x128xf32>
    %34 = vector.broadcast %33 : vector<1x128xf32> to vector<16x128xf32>
    %35 = arith.mulf %31, %34 : vector<16x128xf32>
    %c6 = arith.constant 6 : index
    %c0_30 = arith.constant 0 : index
    %c0_31 = arith.constant 0 : index
    %36 = vector.load %arg2[%c6, %c0_30, %c0_31] : memref<8x16x128xf32, #tpu.memory_space<vmem>>, vector<1x16x128xf32>
    %37 = vector.shape_cast %36 : vector<1x16x128xf32> to vector<16x128xf32>
    %c6_32 = arith.constant 6 : index
    %c0_33 = arith.constant 0 : index
    %c0_34 = arith.constant 0 : index
    %38 = vector.load %arg3[%c6_32, %c0_33, %c0_34] : memref<8x1x128xf32, #tpu.memory_space<vmem>>, vector<1x1x128xf32>
    %39 = vector.shape_cast %38 : vector<1x1x128xf32> to vector<1x128xf32>
    %40 = vector.broadcast %39 : vector<1x128xf32> to vector<16x128xf32>
    %41 = arith.mulf %37, %40 : vector<16x128xf32>
    %c7 = arith.constant 7 : index
    %c0_35 = arith.constant 0 : index
    %c0_36 = arith.constant 0 : index
    %42 = vector.load %arg2[%c7, %c0_35, %c0_36] : memref<8x16x128xf32, #tpu.memory_space<vmem>>, vector<1x16x128xf32>
    %43 = vector.shape_cast %42 : vector<1x16x128xf32> to vector<16x128xf32>
    %c7_37 = arith.constant 7 : index
    %c0_38 = arith.constant 0 : index
    %c0_39 = arith.constant 0 : index
    %44 = vector.load %arg3[%c7_37, %c0_38, %c0_39] : memref<8x1x128xf32, #tpu.memory_space<vmem>>, vector<1x1x128xf32>
    %45 = vector.shape_cast %44 : vector<1x1x128xf32> to vector<1x128xf32>
    %46 = vector.broadcast %45 : vector<1x128xf32> to vector<16x128xf32>
    %47 = arith.mulf %43, %46 : vector<16x128xf32>
    %48 = arith.addf %5, %11 : vector<16x128xf32>
    %49 = arith.addf %17, %23 : vector<16x128xf32>
    %50 = arith.addf %29, %35 : vector<16x128xf32>
    %51 = arith.addf %41, %47 : vector<16x128xf32>
    %52 = arith.addf %48, %49 : vector<16x128xf32>
    %53 = arith.addf %50, %51 : vector<16x128xf32>
    %54 = arith.addf %52, %53 : vector<16x128xf32>
    %c0_40 = arith.constant 0 : index
    %c0_41 = arith.constant 0 : index
    %55 = vector.load %arg1[%c0_40, %c0_41] : memref<32x16xf32, #tpu.memory_space<vmem>>, vector<32x16xf32>
    %cst = arith.constant dense<0.000000e+00> : vector<32x128xf32>
    %56 = tpu.matmul %55, %54, %cst {dimension_numbers = #tpu.dot_dimension_numbers<[1], [0], [0], [1], [0, 0, 1, 1], [], []>} : vector<32x16xf32>, vector<16x128xf32>, vector<32x128xf32> -> vector<32x128xf32>
    %c0_42 = arith.constant 0 : index
    %c0_43 = arith.constant 0 : index
    %57 = vector.load %arg4[%c0_42, %c0_43] : memref<32x128xf32, #tpu.memory_space<vmem>>, vector<32x128xf32>
    tpu.vector_store %arg4[%c0_42, %c0_43], %56 {strides = array<i32>} : memref<32x128xf32, #tpu.memory_space<vmem>>, vector<32x128xf32>,
    return
  }
  func.func @transform_0(%arg0: i32) -> (i32, i32) {
    %c0_i32 = arith.constant 0 : i32
    %c0_i32_0 = arith.constant 0 : i32
    %c0_i32_1 = arith.constant 0 : i32
    return %c0_i32, %c0_i32_0 : i32, i32
  }
  func.func @transform_1(%arg0: i32) -> (i32, i32, i32) {
    %c0_i32 = arith.constant 0 : i32
    %c0_i32_0 = arith.constant 0 : i32
    %c0_i32_1 = arith.constant 0 : i32
    return %c0_i32, %c0_i32_0, %arg0 : i32, i32, i32
  }
  func.func @transform_2(%arg0: i32) -> (i32, i32, i32) {
    %c0_i32 = arith.constant 0 : i32
    %c0_i32_0 = arith.constant 0 : i32
    %c0_i32_1 = arith.constant 0 : i32
    return %c0_i32, %c0_i32_0, %arg0 : i32, i32, i32
  }
  func.func @transform_3(%arg0: i32) -> (i32, i32) {
    %c0_i32 = arith.constant 0 : i32
    %c0_i32_0 = arith.constant 0 : i32
    return %c0_i32, %arg0 : i32, i32
  }
}

</mosaic_0001>

<bundles_post_ra>
// kernel: tpu_custom_call.1
= control target key start
LH: loop header
LB: loop body
LE: loop exit
PB: predicated region body
PF: predicated region fallthrough
CT: control target
= control target key end

     0   :  { %8 = vsyncpa [#allocation3], 0  ;;  %s455_s0 = inlined_call_operand.vmem [shape: f32[32,16], index: 0, kind: input, shape index: {}]   ;;  %s456_s1 = inlined_call_operand.hbm [shape: f32[8,16,128], index: 1, kind: input, shape index: {}]   ;;  %s457_s2 = inlined_call_operand.vmem [shape: f32[8,1,128], index: 2, kind: input, shape index: {}]   ;;  %s458_s3 = inlined_call_operand.hbm [shape: f32[32,128], index: 3, kind: output, shape index: {}]  }
   0x1   :  { %9 = vsyncpa [#allocation4], 0  ;;  %s361_s12 = smov [#allocation2]   ;;  %s313_s16 = scalar_lea.hbm %s456_s1, 2048 }
   0x2   :  { %s17_s13 = sshll.u32 %s361_s12, 4  ;;  %p314_p0 = scmp.ne.s32.totalorder %s456_s1, %s313_s16  ;;  %s18_s13 = int_to_ptr.vmem [resolvable:$true] %s17_s13 }
   0x3   :  { %p317_p1 = scmp.lt.u32.totalorder %s313_s16, %s456_s1 }
   0x5   :  { %p319_p2 = pnand %p317_p1, %p314_p0 }
   0x7   :  { %322 = shalt.err (!%p319_p2)
}
   0x8   :  { %s323_s21 = scalar_lea.vmem %s18_s13, 2048  ;;  %p328_p4 = scmp.lt.s32.totalorder %s18_s13, %s18_s13 }
   0x9   :  { %p324_p3 = scmp.ne.s32.totalorder %s18_s13, %s323_s21  ;;  %p329_p5 = scmp.lt.s32.totalorder %s323_s21, %s323_s21 }
   0xb   :  { %p330_p6 = por %p329_p5, %p328_p4 }
   0xd   :  { %p331_p7 = pnand %p330_p6, %p324_p3 }
   0xf   :  { %334 = shalt.err (!%p331_p7)
}
  0x10   :  { %s362_s22 = smov 128   ;;  %s363_s23 = smov 8  }
  0x11   :  { %23 = dma.hbm_to_vmem [thread:$0]  %s456_s1, 2048, %s18_s13, [#allocation3], %s362_s22, %s362_s22, %s363_s23  }
  0x12   :  { %357 = dma.done.wait [#allocation3], 2048  }
  0x13   :  { %358 = vsyncadd [#allocation3], 4294965248  ;;  %v29_v0 = vld [vmem:[#allocation2] sm:$0xff]  ;;  %v30_v1 = vld [vmem:[#allocation2 + $0x8] sm:$0xff]  ;;  %vm149_vm0 = vcmask 130048   ;;  %s364_s21 = smov [#allocation5]  }
  0x14   :  { %v268_v2 = vld [vmem:[%s457_s2] ss:$0 sm:$0xff]  ;;  %v41_v5 = vld [vmem:[#allocation2 + $0x10] sm:$0xff]  ;;  %v42_v6 = vld [vmem:[#allocation2 + $0x18] sm:$0xff]  ;;  %s256_s24 = sshll.u32 %s364_s21, 4  ;;  %s257_s24 = int_to_ptr.vmem [resolvable:$true] %s256_s24 }
  0x15   :  { %v38_v3 = vmul.f32 %v268_v2, %v29_v0  ;;  %v39_v4 = vmul.f32 %v268_v2, %v30_v1  ;;  %v270_v7 = vld [vmem:[%s457_s2 + $0x1] ss:$0 sm:$0xff]  ;;  %v55_v11 = vld [vmem:[#allocation2 + $0x28] sm:$0xff]  ;;  %v272_v12 = vld [vmem:[%s457_s2 + $0x2] ss:$0 sm:$0xff]  ;;  %s335_s25 = scalar_lea.vmem %s257_s24, 512  ;;  %p340_p9 = scmp.lt.s32.totalorder %s257_s24, %s257_s24 }
  0x16   :  { %v51_v8 = vmul.f32 %v270_v7, %v41_v5  ;;  %v52_v9 = vmul.f32 %v270_v7, %v42_v6  ;;  %v54_v10 = vld [vmem:[#allocation2 + $0x20] sm:$0xff]  ;;  %v65_v14 = vmul.f32 %v272_v12, %v55_v11  ;;  %v67_v15 = vld [vmem:[#allocation2 + $0x30] sm:$0xff]  ;;  %v68_v16 = vld [vmem:[#allocation2 + $0x38] sm:$0xff]  ;;  %p336_p8 = scmp.ne.s32.totalorder %s257_s24, %s335_s25  ;;  %p341_p10 = scmp.lt.s32.totalorder %s335_s25, %s335_s25 }
  0x17   :  { %v64_v13 = vmul.f32 %v272_v12, %v54_v10  ;;  %v274_v17 = vld [vmem:[%s457_s2 + $0x3] ss:$0 sm:$0xff]  ;;  %v81_v21 = vld [vmem:[#allocation2 + $0x48] sm:$0xff]  ;;  %v276_v22 = vld [vmem:[%s457_s2 + $0x4] ss:$0 sm:$0xff] }
  0x18   :  { %v77_v18 = vmul.f32 %v274_v17, %v67_v15  ;;  %v78_v19 = vmul.f32 %v274_v17, %v68_v16  ;;  %v80_v20 = vld [vmem:[#allocation2 + $0x40] sm:$0xff]  ;;  %v91_v24 = vmul.f32 %v276_v22, %v81_v21  ;;  %v93_v25 = vld [vmem:[#allocation2 + $0x50] sm:$0xff]  ;;  %v94_v26 = vld [vmem:[#allocation2 + $0x58] sm:$0xff]  ;;  %v131_v28 = vadd.f32 %v51_v8, %v38_v3  ;;  %p342_p11 = por %p341_p10, %p340_p9 }
  0x19   :  { %v90_v23 = vmul.f32 %v276_v22, %v80_v20  ;;  %v278_v27 = vld [vmem:[%s457_s2 + $0x5] ss:$0 sm:$0xff]  ;;  %v132_v29 = vadd.f32 %v52_v9, %v39_v4  ;;  %v107_v33 = vld [vmem:[#allocation2 + $0x68] sm:$0xff]  ;;  %v280_v34 = vld [vmem:[%s457_s2 + $0x6] ss:$0 sm:$0xff] }
  0x1a   :  { %v103_v30 = vmul.f32 %v278_v27, %v93_v25  ;;  %v104_v31 = vmul.f32 %v278_v27, %v94_v26  ;;  %v106_v32 = vld [vmem:[#allocation2 + $0x60] sm:$0xff]  ;;  %v133_v35 = vadd.f32 %v77_v18, %v64_v13  ;;  %v134_v36 = vadd.f32 %v78_v19, %v65_v14  ;;  %v119_v39 = vld [vmem:[#allocation2 + $0x70] sm:$0xff]  ;;  %v120_v40 = vld [vmem:[#allocation2 + $0x78] sm:$0xff]  ;;  %p343_p12 = pnand %p342_p11, %p336_p8 }
  0x1b   :  { %v116_v37 = vmul.f32 %v280_v34, %v106_v32  ;;  %v117_v38 = vmul.f32 %v280_v34, %v107_v33  ;;  %v282_v41 = vld [vmem:[%s457_s2 + $0x7] ss:$0 sm:$0xff]  ;;  %v147_v47 = vld [vmem:[%s455_s0 + $0x10] sm:$0xff]  ;;  %v146_v57 = vld [vmem:[%s455_s0 + $0x8] sm:$0xff] }
  0x1c   :  { %v129_v42 = vmul.f32 %v282_v41, %v119_v39  ;;  %v130_v43 = vmul.f32 %v282_v41, %v120_v40  ;;  %v135_v44 = vadd.f32 %v103_v30, %v90_v23  ;;  %v136_v45 = vadd.f32 %v104_v31, %v91_v24  ;;  %v145_v46 = vld [vmem:[%s455_s0] sm:$0xff]  ;;  %300 = vmatprep.mubr.msk.f32.mxu1 %vm149_vm0, %v147_v47  ;;  %v148_v58 = vld [vmem:[%s455_s0 + $0x18] sm:$0xff] }
  0x1d   :  { %297 = vmatprep.mubr.msk.f32.mxu0 %vm149_vm0, %v145_v46  ;;  %v139_v50 = vadd.f32 %v133_v35, %v131_v28  ;;  %v140_v51 = vadd.f32 %v134_v36, %v132_v29 }
  0x1e   :  { %v137_v48 = vadd.f32 %v129_v42, %v116_v37  ;;  %v138_v49 = vadd.f32 %v130_v43, %v117_v38 }
  0x20   :  { %v141_v52 = vadd.f32 %v137_v48, %v135_v44  ;;  %v142_v53 = vadd.f32 %v138_v49, %v136_v45 }
  0x22   :  { %v143_v54 = vadd.f32 %v141_v52, %v139_v50  ;;  %v144_v55 = vadd.f32 %v142_v53, %v140_v51 }
  0x24   :  { %v303_v56 = vpack.c.bf16 %v144_v55, %v143_v54 }
  0x26   :  { %304 = vmatprep.subr.bf16.mxu0 %v303_v56  ;;  %307 = vmatprep.subr.bf16.mxu1 %v303_v56 }
  0x27   :  { %306 = vmatpush3.bf16.msra.mxu0 %v303_v56  ;;  %308 = vmatpush3.bf16.msra.mxu1 %v303_v56 }
  0x2a   :  { %298 = vmatmul.mubr.msk.f32.vlgmr.msra.gmra.mrb[0].mxu0 %vm149_vm0, %v146_v57  ;;  %301 = vmatmul.mubr.msk.f32.vlgmr.msra.gmra.mrb[0].mxu1 %vm149_vm0, %v148_v58 }
  0xfd   :  { %v299_v59 = vpop.f32.mrb[0].mxu0  ;;  %v302_v60 = vpop.f32.mrb[0].mxu1 }
  0xfe   :  { %248 = vst [vmem:[#allocation5 + $0x8] sm:$0xff] %v299_v59  ;;  %250 = vst [vmem:[#allocation5 + $0x18] sm:$0xff] %v302_v60  ;;  %v228_v61 = vpop.f32.mrb[1].mxu0  ;;  %v238_v62 = vpop.f32.mrb[1].mxu1 }
  0xff   :  { %247 = vst [vmem:[#allocation5] sm:$0xff] %v228_v61  ;;  %249 = vst [vmem:[#allocation5 + $0x10] sm:$0xff] %v238_v62 }
 0x100   :  { %346 = shalt.err (!%p343_p12)
}
 0x101   :  { %s347_s27 = scalar_lea.hbm %s458_s3, 512 }
 0x102   :  { %p348_p13 = scmp.ne.s32.totalorder %s458_s3, %s347_s27  ;;  %p351_p0 = scmp.lt.u32.totalorder %s347_s27, %s458_s3 }
 0x104   :  { %p353_p1 = pnand %p351_p0, %p348_p13 }
 0x106   :  { %356 = shalt.err (!%p353_p1)
}
 0x107   :  { %262 = dma.vmem_to_hbm [thread:$0]  %s257_s24, 512, %s458_s3, [#allocation4], %s362_s22, %s362_s22, %s363_s23  }
 0x108   :  { %359 = dma.done.wait [#allocation4], 512  }
 0x109   :  { %360 = vsyncadd [#allocation4], 4294966784 }
 0x10a   :  { %266 = vsyncpa [#allocation3], 1 }
 0x10b   :  { %267 = vsyncpa [#allocation4], 1 }

</bundles_post_ra>
